<compile_context>
chip_gen: v6e
topology: v6e:2x2x1
jax: 0.10.0
libtpu: 0.0.40
codegen_flags: <defaults>
</compile_context>

<pallas_src>
import functools

import jax
import jax.numpy as jnp
from jax.experimental import pallas as pl
from jax.experimental.pallas import tpu as pltpu

NUM_GROUPS = 4          # MDEQ's group-norm group count
GN_EPS = 1e-5           # nn.GroupNorm default eps


def _upsample_gn_kernel(x_ref, wbig_ref, a_ref, b_ref, gb_ref, o_ref, *, s, eps):
    # x_ref    : (R, W*Cin)   bf16 activations (NHWC rows; free reshape in wrapper)
    # wbig_ref : (W*Cin, L)   bf16 fused 1x1-conv + W-direction-replication weight
    # a_ref    : (R, R)       bf16 0/1 per-sample row-averaging projection
    # b_ref    : (L, L)       bf16 per-group lane-averaging projection (1/count folded in)
    # gb_ref   : (2, L)       f32  row 0 = gamma tiled per lane, row 1 = beta
    # o_ref    : (R, s*L)     lane-dense output rows; lane order (ih, w, iw, c)
    L = o_ref.shape[-1] // s

    # ---- fused 1x1 conv + W-direction nearest replication (bf16 MXU, f32 acc)
    y = jnp.dot(x_ref[...], wbig_ref[...],
                preferred_element_type=jnp.float32)                    # (R, L) f32

    a = a_ref[...]                                                     # (R, R) bf16
    b = b_ref[...]                                                     # (L, L) bf16

    # ---- GroupNorm statistics: two full-width projections per pass ---------
    # mean_r / var_r are constant over each (sample, group); broadcast to (R, L).
    mean_r = jnp.dot(
        jnp.dot(a, y.astype(jnp.bfloat16),
                preferred_element_type=jnp.float32).astype(jnp.bfloat16),
        b, preferred_element_type=jnp.float32)                         # (R, L)
    d = y - mean_r                                                     # centered, f32
    var_r = jnp.dot(
        jnp.dot(a, (d * d).astype(jnp.bfloat16),
                preferred_element_type=jnp.float32).astype(jnp.bfloat16),
        b, preferred_element_type=jnp.float32)                         # (R, L)
    inv_r = jax.lax.rsqrt(var_r + eps)                                 # EUP slot

    yn = (d * inv_r * gb_ref[0:1, :] + gb_ref[1:2, :]).astype(o_ref.dtype)  # (R, L)

    # ---- H-direction nearest replication = s unmasked lane-dense stores ----
    for ih in range(s):
        o_ref[:, ih * L:(ih + 1) * L] = yn


def build_upsample_constants(w_oc, gamma, beta, *, H, W, block_n,
                             num_groups=NUM_GROUPS, level_diff=1):
    """Build the kernel's invariant operands once (module init), directly in bf16.

    w_oc        : (Cout, Cin)  1x1 conv weight (torch (Cout,Cin,1,1) squeezed)
    gamma, beta : (Cout,)      GroupNorm affine parameters
    block_n     : samples per grid step (N on single-TC v5e/v6e, N//2 on v7x)
    """
    Cout, Cin = w_oc.shape
    G = num_groups
    assert Cout % G == 0
    Cg = Cout // G
    s = 2 ** level_diff
    L = W * s * Cout
    R = block_n * H

    # Fused conv + W-replication weight, bf16 end to end (x 0/1 eye is exact):
    #   wbig[w*Cin + ci, (w*s + iw)*Cout + co] = w[co, ci]
    w_io = jnp.asarray(w_oc, dtype=jnp.bfloat16).T                      # (Cin, Cout)
    eye_w = jnp.eye(W, dtype=jnp.bfloat16)
    wbig = eye_w[:, None, :, None, None] * w_io[None, :, None, None, :]  # (W,Cin,W,1,Cout)
    wbig = jnp.broadcast_to(wbig, (W, Cin, W, s, Cout)).reshape(W * Cin, L)

    # A (R,R): 1 where two rows belong to the same sample (0/1 exact in bf16).
    row = jnp.arange(R, dtype=jnp.int32)
    a_mat = ((row[:, None] // H) == (row[None, :] // H)).astype(jnp.bfloat16)

    # B (L,L): 1/count where two lanes belong to the same GroupNorm group
    # (uniform W-replication leaves per-(sample, group) mean/var unchanged).
    lane = jnp.arange(L, dtype=jnp.int32)
    grp = (lane % Cout) // Cg
    inv_cnt = 1.0 / float(H * W * s * Cg)
    b_mat = ((grp[:, None] == grp[None, :]).astype(jnp.bfloat16)
             * jnp.asarray(inv_cnt, dtype=jnp.bfloat16))

    # gamma/beta packed as one (2, L) f32 operand (per-lane = per-channel tiled).
    gb = jnp.stack([jnp.tile(jnp.asarray(gamma, jnp.float32), W * s),
                    jnp.tile(jnp.asarray(beta, jnp.float32), W * s)], axis=0)

    return wbig, a_mat, b_mat, gb


def upsample_module_forward_nhwc(x_nhwc, wbig, a_mat, b_mat, gb, *,
                                 level_diff=1, eps=GN_EPS,
                                 out_dtype=jnp.bfloat16):
    """UpsampleModule forward, NHWC in / NHWC out (no layout transposes).

    x_nhwc : (N, H, W, Cin) activations (cast to bf16 for the MXU)
    wbig, a_mat, b_mat, gb : outputs of build_upsample_constants
    returns: (N, H*s, W*s, Cout) with s = 2**level_diff
    """
    N, H, W, Cin = x_nhwc.shape
    s = 2 ** level_diff
    L = wbig.shape[1]
    Cout = L // (W * s)
    R = a_mat.shape[0]
    Nb = R // H
    assert R == Nb * H and N % Nb == 0, (R, H, N)
    assert wbig.shape[0] == W * Cin, (wbig.shape, W, Cin)
    # lane-dense path preconditions (see performance review):
    assert (W * Cin) % 128 == 0 and L % 128 == 0, "lane-dense path needs 128-multiples"
    if Nb != N:
        assert R % 8 == 0, "partial-batch blocks need sublane-aligned row counts"

    # NHWC -> (N*H, W*Cin): free contiguous reshape, bf16 for the MXU.
    x2 = x_nhwc.reshape(N * H, W * Cin).astype(jnp.bfloat16)

    kernel = functools.partial(_upsample_gn_kernel, s=s, eps=float(eps))

    out2 = pl.pallas_call(
        kernel,
        out_shape=jax.ShapeDtypeStruct((N * H, s * L), out_dtype),
        grid=(N // Nb,),
        in_specs=[
            pl.BlockSpec((R, W * Cin), lambda bidx: (bidx, 0)),   # activations
            pl.BlockSpec((W * Cin, L), lambda bidx: (0, 0)),      # fused weight
            pl.BlockSpec((R, R), lambda bidx: (0, 0)),            # row projection A
            pl.BlockSpec((L, L), lambda bidx: (0, 0)),            # lane projection B
            pl.BlockSpec((2, L), lambda bidx: (0, 0)),            # gamma/beta
        ],
        out_specs=pl.BlockSpec((R, s * L), lambda bidx: (bidx, 0)),
        compiler_params=pltpu.CompilerParams(
            dimension_semantics=("parallel",)),                   # batch blocks independent
    )(x2, wbig, a_mat, b_mat, gb)

    # Rows ordered (n, h), lanes ordered (ih, w, iw, c): free reshape to NHWC.
    return out2.reshape(N, H * s, W * s, Cout)


def reference_forward_nchw(x_nchw, w_oc, gamma, beta, *, num_groups=NUM_GROUPS,
                           level_diff=1, eps=GN_EPS):
    """Pure-JAX reference mirroring the PyTorch UpsampleModule (NCHW)."""
    s = 2 ** level_diff
    y = jnp.einsum('nchw,oc->nohw', x_nchw, w_oc)                    # 1x1 conv, no bias
    N, Co, H, W = y.shape
    yg = y.reshape(N, num_groups, Co // num_groups, H, W)
    mean = yg.mean(axis=(2, 3, 4), keepdims=True)
    var = yg.var(axis=(2, 3, 4), keepdims=True)
    yn = ((yg - mean) / jnp.sqrt(var + eps)).reshape(N, Co, H, W)
    yn = yn * gamma[None, :, None, None] + beta[None, :, None, None]
    return jnp.repeat(jnp.repeat(yn, s, axis=2), s, axis=3)          # nearest upsample


if __name__ == "__main__":
    # UpsampleModule(num_channels=[16, 32], in_res=1, out_res=0):
    #   inp_chan=32 -> out_chan=16, level_diff=1 -> nearest upsample x2
    N, Cin, Cout, H, W = 4, 32, 16, 8, 8
    level_diff = 1
    s = 2 ** level_diff

    key = jax.random.PRNGKey(0)
    kx, kw, kg, kb = jax.random.split(key, 4)

    # Activations / weights live in bf16 (the dtype the kernel consumes).
    x_nhwc = jax.random.normal(kx, (N, H, W, Cin), dtype=jnp.float32).astype(jnp.bfloat16)
    w_oc = (jax.random.normal(kw, (Cout, Cin), dtype=jnp.float32)
            / jnp.sqrt(Cin)).astype(jnp.bfloat16)
    gamma = 1.0 + 0.1 * jax.random.normal(kg, (Cout,), dtype=jnp.float32)
    beta = 0.1 * jax.random.normal(kb, (Cout,), dtype=jnp.float32)

    # Invariant operands built ONCE (module init).  block_n = N -> a single
    # grid step (right for single-TC v5e/v6e); on v7x use block_n = N // 2 so
    # the "parallel" batch axis gives one step per TensorCore.
    wbig, a_mat, b_mat, gb = build_upsample_constants(
        w_oc, gamma, beta, H=H, W=W, block_n=N,
        num_groups=NUM_GROUPS, level_diff=level_diff)

    out = upsample_module_forward_nhwc(
        x_nhwc, wbig, a_mat, b_mat, gb,
        level_diff=level_diff, out_dtype=jnp.bfloat16)
    out = jax.block_until_ready(out)

    # Reference in PyTorch layout; the transposes below are test-harness only
    # (the compute path is NHWC end to end).
    x_nchw = jnp.transpose(x_nhwc.astype(jnp.float32), (0, 3, 1, 2))
    ref_nchw = reference_forward_nchw(x_nchw, w_oc.astype(jnp.float32), gamma, beta,
                                      num_groups=NUM_GROUPS, level_diff=level_diff)
    ref_nhwc = jnp.transpose(ref_nchw, (0, 2, 3, 1))

    assert out.shape == (N, H * s, W * s, Cout), out.shape
    max_err = float(jnp.max(jnp.abs(out.astype(jnp.float32) - ref_nhwc)))
    assert jnp.allclose(out.astype(jnp.float32), ref_nhwc, atol=5e-2, rtol=5e-2), max_err

    print("KERNEL_OK")
</pallas_src>

<mosaic_0001>
module attributes {stable_mosaic.version = 11 : i64} {
  func.func @_upsample_gn_kernel(%arg0: i32, %arg1: memref<32x256xbf16, #tpu.memory_space<vmem>>, %arg2: memref<256x256xbf16, #tpu.memory_space<vmem>>, %arg3: memref<32x32xbf16, #tpu.memory_space<vmem>>, %arg4: memref<256x256xbf16, #tpu.memory_space<vmem>>, %arg5: memref<2x256xf32, #tpu.memory_space<vmem>>, %arg6: memref<32x512xbf16, #tpu.memory_space<vmem>>) attributes {dimension_semantics = [#tpu.dimension_semantics<parallel>], iteration_bounds = array<i64: 1>, scalar_prefetch = 0 : i64, scratch_operands = 0 : i64, tpu.core_type = #tpu.core_type<tc>, window_params = [{transform_indices = @transform_0, window_bounds = array<i64: 32, 256>}, {pipeline_mode = #tpu.pipeline_mode<synchronous>, transform_indices = @transform_1, window_bounds = array<i64: 256, 256>}, {pipeline_mode = #tpu.pipeline_mode<synchronous>, transform_indices = @transform_2, window_bounds = array<i64: 32, 32>}, {pipeline_mode = #tpu.pipeline_mode<synchronous>, transform_indices = @transform_3, window_bounds = array<i64: 256, 256>}, {pipeline_mode = #tpu.pipeline_mode<synchronous>, transform_indices = @transform_4, window_bounds = array<i64: 2, 256>}, {transform_indices = @transform_5, window_bounds = array<i64: 32, 512>}]} {
    %c0 = arith.constant 0 : index
    %c0_0 = arith.constant 0 : index
    %0 = vector.load %arg1[%c0, %c0_0] : memref<32x256xbf16, #tpu.memory_space<vmem>>, vector<32x256xbf16>
    %c0_1 = arith.constant 0 : index
    %c0_2 = arith.constant 0 : index
    %1 = vector.load %arg2[%c0_1, %c0_2] : memref<256x256xbf16, #tpu.memory_space<vmem>>, vector<256x256xbf16>
    %cst = arith.constant dense<0.000000e+00> : vector<32x256xf32>
    %2 = tpu.matmul %0, %1, %cst {dimension_numbers = #tpu.dot_dimension_numbers<[1], [0], [0], [1], [0, 0, 1, 1], [], []>} : vector<32x256xbf16>, vector<256x256xbf16>, vector<32x256xf32> -> vector<32x256xf32>
    %c0_3 = arith.constant 0 : index
    %c0_4 = arith.constant 0 : index
    %3 = vector.load %arg3[%c0_3, %c0_4] : memref<32x32xbf16, #tpu.memory_space<vmem>>, vector<32x32xbf16>
    %c0_5 = arith.constant 0 : index
    %c0_6 = arith.constant 0 : index
    %4 = vector.load %arg4[%c0_5, %c0_6] : memref<256x256xbf16, #tpu.memory_space<vmem>>, vector<256x256xbf16>
    %5 = arith.truncf %2 : vector<32x256xf32> to vector<32x256xbf16>
    %cst_7 = arith.constant dense<0.000000e+00> : vector<32x256xf32>
    %6 = tpu.matmul %3, %5, %cst_7 {dimension_numbers = #tpu.dot_dimension_numbers<[1], [0], [0], [1], [0, 0, 1, 1], [], []>} : vector<32x32xbf16>, vector<32x256xbf16>, vector<32x256xf32> -> vector<32x256xf32>
    %7 = arith.truncf %6 : vector<32x256xf32> to vector<32x256xbf16>
    %cst_8 = arith.constant dense<0.000000e+00> : vector<32x256xf32>
    %8 = tpu.matmul %7, %4, %cst_8 {dimension_numbers = #tpu.dot_dimension_numbers<[1], [0], [0], [1], [0, 0, 1, 1], [], []>} : vector<32x256xbf16>, vector<256x256xbf16>, vector<32x256xf32> -> vector<32x256xf32>
    %9 = arith.subf %2, %8 : vector<32x256xf32>
    %10 = arith.mulf %9, %9 : vector<32x256xf32>
    %11 = arith.truncf %10 : vector<32x256xf32> to vector<32x256xbf16>
    %cst_9 = arith.constant dense<0.000000e+00> : vector<32x256xf32>
    %12 = tpu.matmul %3, %11, %cst_9 {dimension_numbers = #tpu.dot_dimension_numbers<[1], [0], [0], [1], [0, 0, 1, 1], [], []>} : vector<32x32xbf16>, vector<32x256xbf16>, vector<32x256xf32> -> vector<32x256xf32>
    %13 = arith.truncf %12 : vector<32x256xf32> to vector<32x256xbf16>
    %cst_10 = arith.constant dense<0.000000e+00> : vector<32x256xf32>
    %14 = tpu.matmul %13, %4, %cst_10 {dimension_numbers = #tpu.dot_dimension_numbers<[1], [0], [0], [1], [0, 0, 1, 1], [], []>} : vector<32x256xbf16>, vector<256x256xbf16>, vector<32x256xf32> -> vector<32x256xf32>
    %cst_11 = arith.constant 9.99999974E-6 : f32
    %15 = vector.broadcast %cst_11 : f32 to vector<32x256xf32>
    %16 = arith.addf %14, %15 : vector<32x256xf32>
    %17 = math.rsqrt %16 : vector<32x256xf32>
    %18 = arith.mulf %9, %17 : vector<32x256xf32>
    %c0_12 = arith.constant 0 : index
    %c0_13 = arith.constant 0 : index
    %19 = vector.load %arg5[%c0_12, %c0_13] : memref<2x256xf32, #tpu.memory_space<vmem>>, vector<1x256xf32>
    %20 = vector.broadcast %19 : vector<1x256xf32> to vector<32x256xf32>
    %21 = arith.mulf %18, %20 : vector<32x256xf32>
    %c1 = arith.constant 1 : index
    %c0_14 = arith.constant 0 : index
    %22 = vector.load %arg5[%c1, %c0_14] : memref<2x256xf32, #tpu.memory_space<vmem>>, vector<1x256xf32>
    %23 = vector.broadcast %22 : vector<1x256xf32> to vector<32x256xf32>
    %24 = arith.addf %21, %23 : vector<32x256xf32>
    %25 = arith.truncf %24 : vector<32x256xf32> to vector<32x256xbf16>
    %c0_15 = arith.constant 0 : index
    %c0_16 = arith.constant 0 : index
    %26 = vector.load %arg6[%c0_15, %c0_16] : memref<32x512xbf16, #tpu.memory_space<vmem>>, vector<32x256xbf16>
    tpu.vector_store %arg6[%c0_15, %c0_16], %25 {strides = array<i32>} : memref<32x512xbf16, #tpu.memory_space<vmem>>, vector<32x256xbf16>,
    %c0_17 = arith.constant 0 : index
    %c256 = arith.constant 256 : index
    %27 = vector.load %arg6[%c0_17, %c256] : memref<32x512xbf16, #tpu.memory_space<vmem>>, vector<32x256xbf16>
    tpu.vector_store %arg6[%c0_17, %c256], %25 {strides = array<i32>} : memref<32x512xbf16, #tpu.memory_space<vmem>>, vector<32x256xbf16>,
    return
  }
  func.func @transform_0(%arg0: i32) -> (i32, i32) {
    %c0_i32 = arith.constant 0 : i32
    %c0_i32_0 = arith.constant 0 : i32
    return %arg0, %c0_i32 : i32, i32
  }
  func.func @transform_1(%arg0: i32) -> (i32, i32) {
    %c0_i32 = arith.constant 0 : i32
    %c0_i32_0 = arith.constant 0 : i32
    %c0_i32_1 = arith.constant 0 : i32
    return %c0_i32, %c0_i32_0 : i32, i32
  }
  func.func @transform_2(%arg0: i32) -> (i32, i32) {
    %c0_i32 = arith.constant 0 : i32
    %c0_i32_0 = arith.constant 0 : i32
    %c0_i32_1 = arith.constant 0 : i32
    return %c0_i32, %c0_i32_0 : i32, i32
  }
  func.func @transform_3(%arg0: i32) -> (i32, i32) {
    %c0_i32 = arith.constant 0 : i32
    %c0_i32_0 = arith.constant 0 : i32
    %c0_i32_1 = arith.constant 0 : i32
    return %c0_i32, %c0_i32_0 : i32, i32
  }
  func.func @transform_4(%arg0: i32) -> (i32, i32) {
    %c0_i32 = arith.constant 0 : i32
    %c0_i32_0 = arith.constant 0 : i32
    %c0_i32_1 = arith.constant 0 : i32
    return %c0_i32, %c0_i32_0 : i32, i32
  }
  func.func @transform_5(%arg0: i32) -> (i32, i32) {
    %c0_i32 = arith.constant 0 : i32
    %c0_i32_0 = arith.constant 0 : i32
    return %arg0, %c0_i32 : i32, i32
  }
}

</mosaic_0001>

<bundles_post_ra>
// kernel: tpu_custom_call.1
= control target key start
LH: loop header
LB: loop body
LE: loop exit
PB: predicated region body
PF: predicated region fallthrough
CT: control target
= control target key end

     0   :  { %10 = vsyncpa [#allocation3], 0  ;;  %s1506_s0 = inlined_call_operand.hbm [shape: bf16[32,256], index: 0, kind: input, shape index: {}]   ;;  %s1507_s1 = inlined_call_operand.hbm [shape: bf16[256,256], index: 1, kind: input, shape index: {}]   ;;  %s1508_s2 = inlined_call_operand.hbm [shape: bf16[32,32], index: 2, kind: input, shape index: {}]   ;;  %s1509_s3 = inlined_call_operand.hbm [shape: bf16[256,256], index: 3, kind: input, shape index: {}]   ;;  %s1510_s4 = inlined_call_operand.vmem [shape: f32[2,256], index: 4, kind: input, shape index: {}]   ;;  %s1511_s5 = inlined_call_operand.hbm [shape: bf16[32,512], index: 5, kind: output, shape index: {}]  }
   0x1   :  { %11 = vsyncpa [#allocation6], 0 }
   0x2   :  { %12 = vsyncpa [#allocation9], 0 }
   0x3   :  { %13 = vsyncpa [#allocation4], 0  ;;  %s1234_s18 = smov [#allocation5]   ;;  %s1235_s20 = smov [#allocation2]  }
   0x4   :  { %s31_s19 = sshll.u32 %s1234_s18, 4  ;;  %s19_s21 = sshll.u32 %s1235_s20, 4  ;;  %s32_s19 = int_to_ptr.vmem [resolvable:$true] %s31_s19  ;;  %s20_s21 = int_to_ptr.vmem [resolvable:$true] %s19_s21 }
   0x5   :  { %s1134_s22 = scalar_lea.vmem %s32_s19, 4096  ;;  %p1139_p1 = scmp.lt.s32.totalorder %s32_s19, %s32_s19 }
   0x6   :  { %p1135_p0 = scmp.ne.s32.totalorder %s32_s19, %s1134_s22  ;;  %p1140_p2 = scmp.lt.s32.totalorder %s1134_s22, %s1134_s22 }
   0x8   :  { %p1141_p3 = por %p1140_p2, %p1139_p1 }
   0xa   :  { %p1142_p4 = pnand %p1141_p3, %p1135_p0 }
   0xc   :  { %1145 = shalt.err (!%p1142_p4)
}
   0xd   :  { %s1236_s23 = smov 128   ;;  %s1237_s24 = smov 8  }
   0xe   :  { %37 = dma.hbm_to_vmem [thread:$0]  %s1507_s1, 4096, %s32_s19, [#allocation6], %s1236_s23, %s1236_s23, %s1237_s24  }
   0xf   :  { %s1154_s27 = scalar_lea.vmem %s20_s21, 512  ;;  %p1159_p6 = scmp.lt.s32.totalorder %s20_s21, %s20_s21 }
  0x10   :  { %p1155_p5 = scmp.ne.s32.totalorder %s20_s21, %s1154_s27  ;;  %p1160_p7 = scmp.lt.s32.totalorder %s1154_s27, %s1154_s27 }
  0x12   :  { %p1161_p8 = por %p1160_p7, %p1159_p6 }
  0x14   :  { %p1162_p9 = pnand %p1161_p8, %p1155_p5 }
  0x16   :  { %1165 = shalt.err (!%p1162_p9)
}
  0x17   :  { %25 = dma.hbm_to_vmem [thread:$0]  %s1506_s0, 512, %s20_s21, [#allocation3], %s1236_s23, %s1236_s23, %s1237_s24  }
  0x18   :  { %s1238_s30 = smov [#allocation7]  }
  0x19   :  { %s43_s6 = sshll.u32 %s1238_s30, 4  ;;  %s44_s6 = int_to_ptr.vmem [resolvable:$true] %s43_s6 }
  0x1a   :  { %s1174_s7 = scalar_lea.vmem %s44_s6, 256  ;;  %p1179_p11 = scmp.lt.s32.totalorder %s44_s6, %s44_s6 }
  0x1b   :  { %p1175_p10 = scmp.ne.s32.totalorder %s44_s6, %s1174_s7  ;;  %p1180_p12 = scmp.lt.s32.totalorder %s1174_s7, %s1174_s7 }
  0x1d   :  { %p1181_p13 = por %p1180_p12, %p1179_p11 }
  0x1f   :  { %p1182_p0 = pnand %p1181_p13, %p1175_p10 }
  0x21   :  { %1185 = shalt.err (!%p1182_p0)
}
  0x22   :  { %s1239_s1 = smov 64   ;;  %s1240_s8 = smov 4  }
  0x23   :  { %49 = dma.hbm_to_vmem [thread:$0]  %s1508_s2, 256, %s44_s6, [#allocation6], %s1239_s1, %s1239_s1, %s1240_s8  }
  0x24   :  { %s1241_s11 = smov [#allocation8]  }
  0x25   :  { %s55_s12 = sshll.u32 %s1241_s11, 4  ;;  %s56_s12 = int_to_ptr.vmem [resolvable:$true] %s55_s12 }
  0x26   :  { %s1194_s0 = scalar_lea.vmem %s56_s12, 4096  ;;  %p1199_p2 = scmp.lt.s32.totalorder %s56_s12, %s56_s12 }
  0x27   :  { %p1195_p1 = scmp.ne.s32.totalorder %s56_s12, %s1194_s0  ;;  %p1200_p3 = scmp.lt.s32.totalorder %s1194_s0, %s1194_s0 }
  0x29   :  { %p1201_p4 = por %p1200_p3, %p1199_p2 }
  0x2b   :  { %p1202_p5 = pnand %p1201_p4, %p1195_p1 }
  0x2d   :  { %1205 = shalt.err (!%p1202_p5)
}
  0x2e   :  { %61 = dma.hbm_to_vmem [thread:$0]  %s1509_s3, 4096, %s56_s12, [#allocation9], %s1236_s23, %s1236_s23, %s1237_s24  }
  0x2f   :  { %1226 = dma.done.wait [#allocation3], 512  }
  0x30   :  { %1227 = vsyncadd [#allocation3], 4294966784 }
  0x31   :  { %1228 = dma.done.wait [#allocation6], 4352  }
  0x32   :  { %1229 = vsyncadd [#allocation6], 4294962944 }
  0x33   :  { %1230 = dma.done.wait [#allocation9], 4096  }
  0x34   :  { %1231 = vsyncadd [#allocation9], 4294963200  ;;  %v1006_v0 = vld [vmem:[#allocation5 + $0x74] ss:$8 sps:$4 sm:$0xff]   ;;  %v1008_v1 = vld [vmem:[#allocation5 + $0x70] ss:$8 sps:$4 sm:$0xff]  }
  0x35   :  { %293 = vmatprep.subr.bf16.mxu0 %v1006_v0  ;;  %v1009_v2 = vld [vmem:[#allocation5 + $0x64] ss:$8 sps:$4 sm:$0xff]   ;;  %v1011_v3 = vld [vmem:[#allocation5 + $0x60] ss:$8 sps:$4 sm:$0xff]   ;;  %v1012_v4 = vld [vmem:[#allocation5 + $0x54] ss:$8 sps:$4 sm:$0xff]  }
  0x36   :  { %294 = vmatpush1.bf16.msra.mxu0 %v1008_v1  ;;  %v1014_v5 = vld [vmem:[#allocation5 + $0x50] ss:$8 sps:$4 sm:$0xff]   ;;  %v1015_v6 = vld [vmem:[#allocation5 + $0x44] ss:$8 sps:$4 sm:$0xff]   ;;  %v1017_v7 = vld [vmem:[#allocation5 + $0x40] ss:$8 sps:$4 sm:$0xff]  }
  0x37   :  { %295 = vmatprep.subr.bf16.mxu0 %v1009_v2  ;;  %v1018_v8 = vld [vmem:[#allocation5 + $0x34] ss:$8 sps:$4 sm:$0xff]   ;;  %v1020_v9 = vld [vmem:[#allocation5 + $0x30] ss:$8 sps:$4 sm:$0xff]   ;;  %v1021_v10 = vld [vmem:[#allocation5 + $0x24] ss:$8 sps:$4 sm:$0xff]  }
  0x38   :  { %v1023_v11 = vld [vmem:[#allocation5 + $0x20] ss:$8 sps:$4 sm:$0xff]   ;;  %v1024_v12 = vld [vmem:[#allocation5 + $0x14] ss:$8 sps:$4 sm:$0xff]   ;;  %v1056_v13 = vld [vmem:[#allocation2 + $0x4] ss:$8 sps:$4 sm:$0xff]  }
  0x39   :  { %v1026_v14 = vld [vmem:[#allocation5 + $0x10] ss:$8 sps:$4 sm:$0xff]   ;;  %v1027_v15 = vld [vmem:[#allocation5 + $0x4] ss:$8 sps:$4 sm:$0xff]   ;;  %325 = vmatprep.mubr.bf16.mxu0 %v1056_v13  ;;  %v1029_v16 = vld [vmem:[#allocation5] ss:$8 sps:$4 sm:$0xff]  }
  0x3a   :  { %296 = vmatpush1.bf16.msra.mxu0 %v1011_v3  ;;  %v1030_v17 = vld [vmem:[#allocation5 + $0xf4] ss:$8 sps:$4 sm:$0xff]   ;;  %v1032_v18 = vld [vmem:[#allocation5 + $0xf0] ss:$8 sps:$4 sm:$0xff]   ;;  %v1033_v19 = vld [vmem:[#allocation5 + $0xe4] ss:$8 sps:$4 sm:$0xff]  }
  0x3b   :  { %297 = vmatprep.subr.bf16.mxu0 %v1012_v4  ;;  %v1035_v20 = vld [vmem:[#allocation5 + $0xe0] ss:$8 sps:$4 sm:$0xff]   ;;  %v1036_v21 = vld [vmem:[#allocation5 + $0xd4] ss:$8 sps:$4 sm:$0xff]   ;;  %v1038_v22 = vld [vmem:[#allocation5 + $0xd0] ss:$8 sps:$4 sm:$0xff]  }
  0x3c   :  { %v1039_v23 = vld [vmem:[#allocation5 + $0xc4] ss:$8 sps:$4 sm:$0xff]   ;;  %v1041_v24 = vld [vmem:[#allocation5 + $0xc0] ss:$8 sps:$4 sm:$0xff]   ;;  %v1042_v25 = vld [vmem:[#allocation5 + $0xb4] ss:$8 sps:$4 sm:$0xff]  }
  0x3d   :  { %v1044_v26 = vld [vmem:[#allocation5 + $0xb0] ss:$8 sps:$4 sm:$0xff]   ;;  %v1045_v27 = vld [vmem:[#allocation5 + $0xa4] ss:$8 sps:$4 sm:$0xff]   ;;  %v1047_v28 = vld [vmem:[#allocation5 + $0xa0] ss:$8 sps:$4 sm:$0xff]  }
  0x3e   :  { %298 = vmatpush1.bf16.msra.mxu0 %v1014_v5  ;;  %v1048_v29 = vld [vmem:[#allocation5 + $0x94] ss:$8 sps:$4 sm:$0xff]   ;;  %v1050_v30 = vld [vmem:[#allocation5 + $0x90] ss:$8 sps:$4 sm:$0xff]   ;;  %v1051_v31 = vld [vmem:[#allocation5 + $0x84] ss:$8 sps:$4 sm:$0xff]  }
  0x3f   :  { %299 = vmatprep.subr.bf16.mxu0 %v1015_v6  ;;  %v1053_v32 = vld [vmem:[#allocation5 + $0x80] ss:$8 sps:$4 sm:$0xff]   ;;  %v1057_v34 = vld [vmem:[#allocation2 + $0x14] ss:$8 sps:$4 sm:$0xff]   ;;  %v1059_v35 = vld [vmem:[#allocation2 + $0x10] ss:$8 sps:$4 sm:$0xff]  }
  0x40   :  { %v1054_v33 = vld [vmem:[#allocation2] ss:$8 sps:$4 sm:$0xff]   ;;  %v1242_v36 = vmov 0   ;;  %v1298_v37 = vld [vmem:[#allocation8 + $0x74] ss:$8 sps:$4 sm:$0xff]   ;;  %vm396_vm0 = vcmask 261120  }
  0x41   :  { %v1300_v38 = vld [vmem:[#allocation8 + $0x70] ss:$8 sps:$4 sm:$0xff]   ;;  %v1302_v39 = vld [vmem:[#allocation8 + $0x64] ss:$8 sps:$4 sm:$0xff]   ;;  %620 = vmatprep.subr.bf16.mxu1 %v1298_v37  ;;  %v1306_v40 = vld [vmem:[#allocation8 + $0x60] ss:$8 sps:$4 sm:$0xff]  }
  0x42   :  { %300 = vmatpush1.bf16.msra.mxu0 %v1017_v7  ;;  %621 = vmatpush1.bf16.msra.mxu1 %v1300_v38  ;;  %v1309_v41 = vld [vmem:[#allocation8 + $0x54] ss:$8 sps:$4 sm:$0xff]   ;;  %v1312_v42 = vld [vmem:[#allocation8 + $0x50] ss:$8 sps:$4 sm:$0xff]   ;;  %v1315_v43 = vld [vmem:[#allocation8 + $0x44] ss:$8 sps:$4 sm:$0xff]  }
  0x43   :  { %301 = vmatprep.subr.bf16.mxu0 %v1018_v8  ;;  %622 = vmatprep.subr.bf16.mxu1 %v1302_v39  ;;  %v1318_v44 = vld [vmem:[#allocation8 + $0x40] ss:$8 sps:$4 sm:$0xff]   ;;  %v1321_v45 = vld [vmem:[#allocation8 + $0x34] ss:$8 sps:$4 sm:$0xff]   ;;  %v1324_v46 = vld [vmem:[#allocation8 + $0x30] ss:$8 sps:$4 sm:$0xff]  }
  0x44   :  { %v1327_v47 = vld [vmem:[#allocation8 + $0x24] ss:$8 sps:$4 sm:$0xff]   ;;  %v1330_v48 = vld [vmem:[#allocation8 + $0x20] ss:$8 sps:$4 sm:$0xff]   ;;  %v1333_v49 = vld [vmem:[#allocation8 + $0x14] ss:$8 sps:$4 sm:$0xff]  }
  0x45   :  { %v1336_v50 = vld [vmem:[#allocation8 + $0x10] ss:$8 sps:$4 sm:$0xff]   ;;  %v1339_v51 = vld [vmem:[#allocation8 + $0x4] ss:$8 sps:$4 sm:$0xff]   ;;  %v1342_v52 = vld [vmem:[#allocation8] ss:$8 sps:$4 sm:$0xff]  }
  0x46   :  { %302 = vmatpush1.bf16.msra.mxu0 %v1020_v9  ;;  %623 = vmatpush1.bf16.msra.mxu1 %v1306_v40  ;;  %v1345_v53 = vld [vmem:[#allocation8 + $0xf4] ss:$8 sps:$4 sm:$0xff]   ;;  %v1348_v54 = vld [vmem:[#allocation8 + $0xf0] ss:$8 sps:$4 sm:$0xff]   ;;  %v1351_v55 = vld [vmem:[#allocation8 + $0xe4] ss:$8 sps:$4 sm:$0xff]  }
  0x47   :  { %303 = vmatprep.subr.bf16.mxu0 %v1021_v10  ;;  %624 = vmatprep.subr.bf16.mxu1 %v1309_v41  ;;  %v1354_v56 = vld [vmem:[#allocation8 + $0xe0] ss:$8 sps:$4 sm:$0xff]   ;;  %v1357_v57 = vld [vmem:[#allocation8 + $0xd4] ss:$8 sps:$4 sm:$0xff]   ;;  %v1360_v58 = vld [vmem:[#allocation8 + $0xd0] ss:$8 sps:$4 sm:$0xff]  }
  0x48   :  { %v1363_v59 = vld [vmem:[#allocation8 + $0xc4] ss:$8 sps:$4 sm:$0xff]   ;;  %v1366_v60 = vld [vmem:[#allocation8 + $0xc0] ss:$8 sps:$4 sm:$0xff]   ;;  %v1369_v61 = vld [vmem:[#allocation8 + $0xb4] ss:$8 sps:$4 sm:$0xff]  }
  0x49   :  { %v1372_v62 = vld [vmem:[#allocation8 + $0xb0] ss:$8 sps:$4 sm:$0xff]   ;;  %v1375_v63 = vld [vmem:[#allocation8 + $0xa4] ss:$8 sps:$4 sm:$0xff]   ;;  %v1378_v0 = vld [vmem:[#allocation8 + $0xa0] ss:$8 sps:$4 sm:$0xff]  }
  0x4a   :  { %304 = vmatpush1.bf16.msra.mxu0 %v1023_v11  ;;  %625 = vmatpush1.bf16.msra.mxu1 %v1312_v42  ;;  %v1406_v13 = vld [vmem:[#allocation7] sm:$0xff]  }
  0x4b   :  { %305 = vmatprep.subr.bf16.mxu0 %v1024_v12  ;;  %626 = vmatprep.subr.bf16.mxu1 %v1315_v43 }
  0x4e   :  { %306 = vmatpush1.bf16.msra.mxu0 %v1026_v14  ;;  %627 = vmatpush1.bf16.msra.mxu1 %v1318_v44  ;;  %v1411_v14 = vld [vmem:[#allocation7 + $0x8] sm:$0xff]  }
  0x4f   :  { %307 = vmatprep.subr.bf16.mxu0 %v1027_v15  ;;  %628 = vmatprep.subr.bf16.mxu1 %v1321_v45  ;;  %v1104_v15 = vld [vmem:[#allocation8 + $0x94] ss:$8 sps:$4 sm:$0xff]  }
  0x52   :  { %308 = vmatpush1.bf16.msra.mxu0 %v1029_v16  ;;  %629 = vmatpush1.bf16.msra.mxu1 %v1324_v46  ;;  %v1106_v16 = vld [vmem:[#allocation8 + $0x90] ss:$8 sps:$4 sm:$0xff]  }
  0x53   :  { %309 = vmatprep.subr.bf16.mxu0 %v1030_v17  ;;  %630 = vmatprep.subr.bf16.mxu1 %v1327_v47  ;;  %v1107_v17 = vld [vmem:[#allocation8 + $0x84] ss:$8 sps:$4 sm:$0xff]  }
  0x56   :  { %310 = vmatpush2.bf16.msra.mxu0 %v1032_v18  ;;  %631 = vmatpush1.bf16.msra.mxu1 %v1330_v48  ;;  %v1109_v18 = vld [vmem:[#allocation8 + $0x80] ss:$8 sps:$4 sm:$0xff]  }
  0x57   :  { %311 = vmatprep.subr.bf16.mxu0 %v1033_v19  ;;  %632 = vmatprep.subr.bf16.mxu1 %v1333_v49 }
  0x5a   :  { %312 = vmatpush2.bf16.msra.mxu0 %v1035_v20  ;;  %633 = vmatpush1.bf16.msra.mxu1 %v1336_v50 }
  0x5b   :  { %313 = vmatprep.subr.bf16.mxu0 %v1036_v21  ;;  %634 = vmatprep.subr.bf16.mxu1 %v1339_v51 }
  0x5e   :  { %314 = vmatpush2.bf16.msra.mxu0 %v1038_v22  ;;  %635 = vmatpush1.bf16.msra.mxu1 %v1342_v52 }
  0x5f   :  { %315 = vmatprep.subr.bf16.mxu0 %v1039_v23  ;;  %636 = vmatprep.subr.bf16.mxu1 %v1345_v53 }
  0x62   :  { %316 = vmatpush2.bf16.msra.mxu0 %v1041_v24  ;;  %637 = vmatpush2.bf16.msra.mxu1 %v1348_v54 }
  0x63   :  { %317 = vmatprep.subr.bf16.mxu0 %v1042_v25  ;;  %638 = vmatprep.subr.bf16.mxu1 %v1351_v55 }
  0x66   :  { %318 = vmatpush2.bf16.msra.mxu0 %v1044_v26  ;;  %639 = vmatpush2.bf16.msra.mxu1 %v1354_v56 }
  0x67   :  { %319 = vmatprep.subr.bf16.mxu0 %v1045_v27  ;;  %640 = vmatprep.subr.bf16.mxu1 %v1357_v57 }
  0x6a   :  { %320 = vmatpush2.bf16.msra.mxu0 %v1047_v28  ;;  %641 = vmatpush2.bf16.msra.mxu1 %v1360_v58 }
  0x6b   :  { %321 = vmatprep.subr.bf16.mxu0 %v1048_v29  ;;  %642 = vmatprep.subr.bf16.mxu1 %v1363_v59 }
  0x6e   :  { %322 = vmatpush2.bf16.msra.mxu0 %v1050_v30  ;;  %643 = vmatpush2.bf16.msra.mxu1 %v1366_v60 }
  0x6f   :  { %323 = vmatprep.subr.bf16.mxu0 %v1051_v31  ;;  %644 = vmatprep.subr.bf16.mxu1 %v1369_v61 }
  0x72   :  { %324 = vmatpush2.bf16.msra.mxu0 %v1053_v32  ;;  %645 = vmatpush2.bf16.msra.mxu1 %v1372_v62 }
  0x73   :  { %646 = vmatprep.subr.bf16.mxu1 %v1375_v63 }
  0x75   :  { %326 = vmatmul.mubr.bf16.vlgmr.msra.gmra.mxu0 %v1054_v33 }
  0x76   :  { %335 = vmatprep.mubr.bf16.mxu0 %v1057_v34  ;;  %647 = vmatpush2.bf16.msra.mxu1 %v1378_v0 }
  0x77   :  { %648 = vmatprep.subr.bf16.mxu1 %v1104_v15 }
  0x7a   :  { %649 = vmatpush2.bf16.msra.mxu1 %v1106_v16 }
  0x7b   :  { %650 = vmatprep.subr.bf16.mxu1 %v1107_v17 }
  0x7d   :  { %336 = vmatmul.mubr.bf16.gmra.mxu0 %v1059_v35 }
  0x7e   :  { %435 = vmatprep.mubr.bf16.mxu0 %v1242_v36  ;;  %651 = vmatpush2.bf16.msra.mxu1 %v1109_v18 }
  0x7f   :  { %750 = vmatprep.subr.bf16.mxu1 %v1298_v37 }
 0x135   :  { %v1382_v1 = vpop.f32.mrf.mxu0 }
 0x137   :  { %v1384_v2 = vpop.f32.mrf.mxu0 }
 0x139   :  { %v1386_v3 = vpop.f32.mrf.mxu0 }
 0x13a   :  { %v382_v12 = vpack.c.bf16 %v1386_v3, %v1382_v1 }
 0x13b   :  { %v1388_v4 = vpop.f32.mrf.mxu0 }
 0x13c   :  { %v383_v11 = vpack.c.bf16 %v1388_v4, %v1384_v2 }
 0x13d   :  { %v1390_v5 = vpop.f32.mrf.mxu0 }
 0x13f   :  { %v1392_v6 = vpop.f32.mrf.mxu0 }
 0x141   :  { %v1394_v7 = vpop.f32.mrf.mxu0 }
 0x142   :  { %v384_v10 = vpack.c.bf16 %v1394_v7, %v1390_v5 }
 0x143   :  { %v1396_v8 = vpop.f32.mrf.mxu0 }
 0x144   :  { %v385_v9 = vpack.c.bf16 %v1396_v8, %v1392_v6 }
 0x146   :  { %415 = vmatprep.subr.bf16.mxu0 %v385_v9 }
 0x147   :  { %416 = vmatpush1.bf16.msra.mxu0 %v384_v10  ;;  %v821_v10 = vlaneseq }
 0x148   :  { %417 = vmatprep.subr.bf16.mxu0 %v383_v11 }
 0x14b   :  { %418 = vmatpush1.bf16.msra.mxu0 %v382_v12 }
 0x14e   :  { %949 = vmatmul.mubr.msk.bf16.vlgmr.msra.gmra.mxu0 %vm396_vm0, %v1406_v13 }
 0x14f   :  { %445 = vmatprep.mubr.bf16.mxu0 %v1242_v36 }
 0x156   :  { %950 = vmatmul.mubr.msk.bf16.gmra.mxu0 %vm396_vm0, %v1411_v14 }
 0x157   :  { %725 = vmatprep.mubr.bf16.mxu0 %v1242_v36 }
 0x20e   :  { %v437_v19 = vpop.f32.mrf.mxu0 }
 0x210   :  { %v439_v20 = vpop.f32.mrf.mxu0 }
 0x212   :  { %v441_v21 = vpop.f32.mrf.mxu0 }
 0x213   :  { %v456_v24 = vpack.c.bf16 %v441_v21, %v437_v19 }
 0x214   :  { %v443_v22 = vpop.f32.mrf.mxu0 }
 0x215   :  { %v457_v23 = vpack.c.bf16 %v443_v22, %v439_v20  ;;  %v819_v22 = vld [vmem:[%s1510_s4] ss:$2 sm:$0x3] }
 0x216   :  { %v447_v25 = vpop.f32.mrf.mxu0 }
 0x217   :  { %652 = vmatprep.mubr.bf16.mxu1 %v457_v23 }
 0x218   :  { %v449_v26 = vpop.f32.mrf.mxu0  ;;  %653 = vmatmul.mubr.bf16.vlgmr.msra.gmra.mxu1 %v456_v24 }
 0x219   :  { %751 = vmatpush1.bf16.msra.mxu1 %v1300_v38 }
 0x21a   :  { %v451_v27 = vpop.f32.mrf.mxu0  ;;  %752 = vmatprep.subr.bf16.mxu1 %v1302_v39 }
 0x21b   :  { %v458_v30 = vpack.c.bf16 %v451_v27, %v447_v25 }
 0x21c   :  { %v453_v28 = vpop.f32.mrf.mxu0 }
 0x21d   :  { %v459_v29 = vpack.c.bf16 %v453_v28, %v449_v26  ;;  %753 = vmatpush1.bf16.msra.mxu1 %v1306_v40 }
 0x21e   :  { %754 = vmatprep.subr.bf16.mxu1 %v1309_v41 }
 0x21f   :  { %662 = vmatprep.mubr.bf16.mxu1 %v459_v29 }
 0x220   :  { %663 = vmatmul.mubr.bf16.gmra.mxu1 %v458_v30  ;;  %v985_v30 = vld [vmem:[%s1510_s4 + $0x1] ss:$2 sm:$0x3]  ;;  %s1243_s4 = smov [#allocation10]  }
 0x221   :  { %755 = vmatpush1.bf16.msra.mxu1 %v1312_v42  ;;  %s897_s17 = sshll.u32 %s1243_s4, 4  ;;  %s898_s17 = int_to_ptr.vmem [resolvable:$true] %s897_s17 }
 0x222   :  { %756 = vmatprep.subr.bf16.mxu1 %v1315_v43  ;;  %s1206_s18 = scalar_lea.vmem %s898_s17, 1024  ;;  %p1211_p7 = scmp.lt.s32.totalorder %s898_s17, %s898_s17 }
 0x223   :  { %p1207_p6 = scmp.ne.s32.totalorder %s898_s17, %s1206_s18  ;;  %p1212_p8 = scmp.lt.s32.totalorder %s1206_s18, %s1206_s18 }
 0x225   :  { %757 = vmatpush1.bf16.msra.mxu1 %v1318_v44  ;;  %p1213_p9 = por %p1212_p8, %p1211_p7 }
 0x226   :  { %758 = vmatprep.subr.bf16.mxu1 %v1321_v45 }
 0x227   :  { %p1214_p10 = pnand %p1213_p9, %p1207_p6 }
 0x229   :  { %759 = vmatpush1.bf16.msra.mxu1 %v1324_v46 }
 0x22a   :  { %760 = vmatprep.subr.bf16.mxu1 %v1327_v47 }
 0x22d   :  { %761 = vmatpush1.bf16.msra.mxu1 %v1330_v48 }
 0x22e   :  { %762 = vmatprep.subr.bf16.mxu1 %v1333_v49 }
 0x231   :  { %763 = vmatpush1.bf16.msra.mxu1 %v1336_v50 }
 0x232   :  { %764 = vmatprep.subr.bf16.mxu1 %v1339_v51 }
 0x235   :  { %765 = vmatpush1.bf16.msra.mxu1 %v1342_v52 }
 0x236   :  { %766 = vmatprep.subr.bf16.mxu1 %v1345_v53 }
 0x239   :  { %767 = vmatpush2.bf16.msra.mxu1 %v1348_v54 }
 0x23a   :  { %768 = vmatprep.subr.bf16.mxu1 %v1351_v55 }
 0x23d   :  { %769 = vmatpush2.bf16.msra.mxu1 %v1354_v56 }
 0x23e   :  { %770 = vmatprep.subr.bf16.mxu1 %v1357_v57 }
 0x241   :  { %771 = vmatpush2.bf16.msra.mxu1 %v1360_v58 }
 0x242   :  { %772 = vmatprep.subr.bf16.mxu1 %v1363_v59 }
 0x245   :  { %773 = vmatpush2.bf16.msra.mxu1 %v1366_v60 }
 0x246   :  { %774 = vmatprep.subr.bf16.mxu1 %v1369_v61 }
 0x249   :  { %775 = vmatpush2.bf16.msra.mxu1 %v1372_v62 }
 0x24a   :  { %776 = vmatprep.subr.bf16.mxu1 %v1375_v63 }
 0x24d   :  { %777 = vmatpush2.bf16.msra.mxu1 %v1378_v0 }
 0x24e   :  { %778 = vmatprep.subr.bf16.mxu1 %v1104_v15  ;;  %v822_v15 = vshrl.u32 %v821_v10, 7 }
 0x250   :  { %v823_v20 = vsub.s32 0, %v822_v15  ;;  %v827_v24 = vsub.s32 1, %v822_v15 }
 0x251   :  { %779 = vmatpush2.bf16.msra.mxu1 %v1106_v16 }
 0x252   :  { %780 = vmatprep.subr.bf16.mxu1 %v1107_v17  ;;  %v824_v27 = vrot.slane %v819_v22, %v823_v20 }
 0x255   :  { %781 = vmatpush2.bf16.msra.mxu1 %v1109_v18 }
 0x2d8   :  { %v654_v31 = vpop.f32.mrf.mxu1 }
 0x2d9   :  { %v1474_v51 = vsub.f32 %v1382_v1, %v654_v31 }
 0x2da   :  { %v656_v32 = vpop.f32.mrf.mxu1 }
 0x2db   :  { %v1457_v44 = vsub.f32 %v1384_v2, %v656_v32  ;;  %v681_v58 = vmul.f32 %v1474_v51, %v1474_v51  ;;  %v828_v32 = vrot.slane %v819_v22, %v827_v24 }
 0x2dc   :  { %v658_v33 = vpop.f32.mrf.mxu1 }
 0x2dd   :  { %v1463_v46 = vsub.f32 %v1386_v3, %v658_v33  ;;  %v682_v53 = vmul.f32 %v1457_v44, %v1457_v44 }
 0x2de   :  { %v660_v34 = vpop.f32.mrf.mxu1 }
 0x2df   :  { %v1445_v39 = vsub.f32 %v1388_v4, %v660_v34  ;;  %v683_v55 = vmul.f32 %v1463_v46, %v1463_v46 }
 0x2e0   :  { %v664_v35 = vpop.f32.mrf.mxu1 }
 0x2e1   :  { %v1454_v42 = vsub.f32 %v1390_v5, %v664_v35  ;;  %v684_v48 = vmul.f32 %v1445_v39, %v1445_v39  ;;  %v689_v59 = vpack.c.bf16 %v683_v55, %v681_v58  ;;  %v845_v35 = vrot.slane %v985_v30, %v823_v20 }
 0x2e2   :  { %v666_v37 = vpop.f32.mrf.mxu1 }
 0x2e3   :  { %v1448_v40 = vsub.f32 %v1392_v6, %v666_v37  ;;  %v685_v52 = vmul.f32 %v1454_v42, %v1454_v42  ;;  %v690_v57 = vpack.c.bf16 %v684_v48, %v682_v53 }
 0x2e4   :  { %v668_v38 = vpop.f32.mrf.mxu1 }
 0x2e5   :  { %v1451_v41 = vsub.f32 %v1394_v7, %v668_v38  ;;  %v686_v49 = vmul.f32 %v1448_v40, %v1448_v40  ;;  %v849_v38 = vrot.slane %v985_v30, %v827_v24 }
 0x2e6   :  { %v670_v43 = vpop.f32.mrf.mxu1 }
 0x2e7   :  { %v1460_v45 = vsub.f32 %v1396_v8, %v670_v43  ;;  %v687_v47 = vmul.f32 %v1451_v41, %v1451_v41 }
 0x2e9   :  { %v688_v50 = vmul.f32 %v1460_v45, %v1460_v45  ;;  %v691_v56 = vpack.c.bf16 %v687_v47, %v685_v52 }
 0x2eb   :  { %v692_v54 = vpack.c.bf16 %v688_v50, %v686_v49 }
 0x2ed   :  { %705 = vmatprep.subr.bf16.mxu0 %v692_v54 }
 0x2ee   :  { %706 = vmatpush1.bf16.msra.mxu0 %v691_v56 }
 0x2ef   :  { %707 = vmatprep.subr.bf16.mxu0 %v690_v57 }
 0x2f2   :  { %708 = vmatpush1.bf16.msra.mxu0 %v689_v59 }
 0x2f5   :  { %983 = vmatmul.mubr.msk.bf16.vlgmr.msra.gmra.mxu0 %vm396_vm0, %v1406_v13 }
 0x2f6   :  { %735 = vmatprep.mubr.bf16.mxu0 %v1242_v36 }
 0x2fd   :  { %984 = vmatmul.mubr.msk.bf16.gmra.mxu0 %vm396_vm0, %v1411_v14 }
 0x3b5   :  { %v727_v60 = vpop.f32.mrf.mxu0 }
 0x3b7   :  { %v729_v61 = vpop.f32.mrf.mxu0 }
 0x3b9   :  { %v731_v62 = vpop.f32.mrf.mxu0 }
 0x3ba   :  { %v746_v1 = vpack.c.bf16 %v731_v62, %v727_v60 }
 0x3bb   :  { %v733_v63 = vpop.f32.mrf.mxu0 }
 0x3bc   :  { %v747_v0 = vpack.c.bf16 %v733_v63, %v729_v61 }
 0x3bd   :  { %v737_v2 = vpop.f32.mrf.mxu0 }
 0x3be   :  { %782 = vmatprep.mubr.bf16.mxu1 %v747_v0 }
 0x3bf   :  { %v739_v3 = vpop.f32.mrf.mxu0  ;;  %783 = vmatmul.mubr.bf16.vlgmr.msra.gmra.mxu1 %v746_v1 }
 0x3c1   :  { %v741_v4 = vpop.f32.mrf.mxu0 }
 0x3c2   :  { %v748_v7 = vpack.c.bf16 %v741_v4, %v737_v2 }
 0x3c3   :  { %v743_v5 = vpop.f32.mrf.mxu0 }
 0x3c4   :  { %v749_v6 = vpack.c.bf16 %v743_v5, %v739_v3 }
 0x3c6   :  { %792 = vmatprep.mubr.bf16.mxu1 %v749_v6 }
 0x3c7   :  { %793 = vmatmul.mubr.bf16.gmra.mxu1 %v748_v7 }
 0x47f   :  { %v784_v36 = vpop.f32.mrf.mxu1 }
 0x480   :  { %v785_v8 = vadd.f32 1e-05, %v784_v36 }
 0x481   :  { %v786_v9 = vpop.f32.mrf.mxu1 }
 0x482   :  { %1110 = vrsqrt.f32 %v785_v8  ;;  %v787_v11 = vadd.f32 1e-05, %v786_v9 }
 0x483   :  { %v788_v12 = vpop.f32.mrf.mxu1 }
 0x484   :  { %1112 = vrsqrt.f32 %v787_v11  ;;  %v789_v13 = vadd.f32 1e-05, %v788_v12 }
 0x485   :  { %v790_v14 = vpop.f32.mrf.mxu1 }
 0x486   :  { %1114 = vrsqrt.f32 %v789_v13  ;;  %v791_v16 = vadd.f32 1e-05, %v790_v14 }
 0x487   :  { %v794_v17 = vpop.f32.mrf.mxu1 }
 0x488   :  { %1116 = vrsqrt.f32 %v791_v16  ;;  %v795_v18 = vadd.f32 1e-05, %v794_v17 }
 0x489   :  { %v796_v19 = vpop.f32.mrf.mxu1 }
 0x48a   :  { %1118 = vrsqrt.f32 %v795_v18  ;;  %v797_v21 = vadd.f32 1e-05, %v796_v19 }
 0x48b   :  { %v798_v23 = vpop.f32.mrf.mxu1 }
 0x48c   :  { %1120 = vrsqrt.f32 %v797_v21  ;;  %v799_v25 = vadd.f32 1e-05, %v798_v23 }
 0x48d   :  { %v800_v26 = vpop.f32.mrf.mxu1 }
 0x48e   :  { %1122 = vrsqrt.f32 %v799_v25  ;;  %v801_v28 = vadd.f32 1e-05, %v800_v26 }
 0x48f   :  { %v1111_v29 = vpop.eup %1110 }
 0x490   :  { %v811_v31 = vmul.f32 %v1111_v29, %v1474_v51  ;;  %1124 = vrsqrt.f32 %v801_v28 }
 0x491   :  { %v1113_v33 = vpop.eup %1112 }
 0x492   :  { %v831_v34 = vmul.f32 %v824_v27, %v811_v31  ;;  %v812_v37 = vmul.f32 %v1113_v33, %v1457_v44 }
 0x493   :  { %v1115_v43 = vpop.eup %1114 }
 0x494   :  { %v832_v47 = vmul.f32 %v828_v32, %v812_v37  ;;  %v813_v48 = vmul.f32 %v1115_v43, %v1463_v46  ;;  %v852_v50 = vadd.f32 %v845_v35, %v831_v34 }
 0x495   :  { %v1117_v49 = vpop.eup %1116 }
 0x496   :  { %v853_v52 = vadd.f32 %v849_v38, %v832_v47  ;;  %v833_v53 = vmul.f32 %v824_v27, %v813_v48  ;;  %v814_v54 = vmul.f32 %v1117_v49, %v1445_v39 }
 0x497   :  { %v1119_v55 = vpop.eup %1118 }
 0x498   :  { %v990_v51 = vpack.c.bf16 %v853_v52, %v852_v50  ;;  %v834_v56 = vmul.f32 %v828_v32, %v814_v54  ;;  %v815_v57 = vmul.f32 %v1119_v55, %v1454_v42  ;;  %v854_v44 = vadd.f32 %v845_v35, %v833_v53 }
 0x499   :  { %v1121_v58 = vpop.eup %1120 }
 0x49a   :  { %884 = vst [vmem:[#allocation10] sm:$0xff] %v990_v51  ;;  %888 = vst [vmem:[#allocation10 + $0x8] sm:$0xff] %v990_v51  ;;  %v855_v59 = vadd.f32 %v849_v38, %v834_v56  ;;  %v835_v60 = vmul.f32 %v824_v27, %v815_v57  ;;  %v816_v61 = vmul.f32 %v1121_v58, %v1448_v40 }
 0x49b   :  { %v1123_v46 = vpop.eup %1122 }
 0x49c   :  { %v991_v62 = vpack.c.bf16 %v855_v59, %v854_v44  ;;  %v836_v63 = vmul.f32 %v828_v32, %v816_v61  ;;  %v817_v0 = vmul.f32 %v1123_v46, %v1451_v41  ;;  %v856_v39 = vadd.f32 %v845_v35, %v835_v60 }
 0x49d   :  { %v1125_v1 = vpop.eup %1124 }
 0x49e   :  { %885 = vst [vmem:[#allocation10 + $0x10] sm:$0xff] %v991_v62  ;;  %889 = vst [vmem:[#allocation10 + $0x18] sm:$0xff] %v991_v62  ;;  %v857_v2 = vadd.f32 %v849_v38, %v836_v63  ;;  %v837_v3 = vmul.f32 %v824_v27, %v817_v0  ;;  %v818_v42 = vmul.f32 %v1125_v1, %v1460_v45 }
 0x4a0   :  { %v992_v4 = vpack.c.bf16 %v857_v2, %v856_v39  ;;  %v838_v5 = vmul.f32 %v828_v32, %v818_v42  ;;  %v858_v40 = vadd.f32 %v845_v35, %v837_v3 }
 0x4a2   :  { %886 = vst [vmem:[#allocation10 + $0x20] sm:$0xff] %v992_v4  ;;  %890 = vst [vmem:[#allocation10 + $0x28] sm:$0xff] %v992_v4  ;;  %v859_v6 = vadd.f32 %v849_v38, %v838_v5 }
 0x4a4   :  { %v993_v7 = vpack.c.bf16 %v859_v6, %v858_v40 }
 0x4a6   :  { %887 = vst [vmem:[#allocation10 + $0x30] sm:$0xff] %v993_v7  ;;  %891 = vst [vmem:[#allocation10 + $0x38] sm:$0xff] %v993_v7 }
 0x4a7   :  { %1217 = shalt.err (!%p1214_p10)
}
 0x4a8   :  { %s1244_s19 = smov 256   ;;  %s1245_s20 = smov 16  }
 0x4a9   :  { %903 = dma.vmem_to_hbm [thread:$0]  %s898_s17, 1024, %s1511_s5, [#allocation4], %s1244_s19, %s1244_s19, %s1245_s20  }
 0x4aa   :  { %1232 = dma.done.wait [#allocation4], 1024  }
 0x4ab   :  { %1233 = vsyncadd [#allocation4], 4294966272 }
 0x4ac   :  { %907 = vsyncpa [#allocation3], 1 }
 0x4ad   :  { %908 = vsyncpa [#allocation6], 1 }
 0x4ae   :  { %909 = vsyncpa [#allocation9], 1 }
 0x4af   :  { %910 = vsyncpa [#allocation4], 1 }

</bundles_post_ra>
